<compile_context>
chip_gen: v7x
topology: tpu7x:2x2x1
jax: 0.10.0
libtpu: 0.0.40
codegen_flags: <defaults>
</compile_context>

<pallas_src>
import functools

import jax
import jax.numpy as jnp
from jax.experimental import pallas as pl
from jax.experimental.pallas import tpu as pltpu


def _round_up(x, m):
    return ((x + m - 1) // m) * m


def _sublane_multiple(dtype):
    return {4: 8, 2: 16, 1: 32}.get(jnp.dtype(dtype).itemsize, 8)


def _pick_tile(dim_aligned, unit, max_tile):
    """Largest multiple of `unit` that divides `dim_aligned` and is <= max_tile.

    `dim_aligned` must itself be a multiple of `unit`, so the result always
    exists; guarantees zero padding beyond the (sublane, lane) alignment.
    """
    max_tile = max(unit, min(max_tile, dim_aligned))
    best = unit
    t = unit
    while t <= max_tile:
        if dim_aligned % t == 0:
            best = t
        t += unit
    return best


# ---------------------------------------------------------------------------
# Kernels
# ---------------------------------------------------------------------------
def _matmul_bias_relu_kernel(x_ref, w_ref, b_ref, o_ref, acc_ref):
    k = pl.program_id(2)

    @pl.when(k == 0)
    def _():
        acc_ref[...] = jnp.zeros_like(acc_ref)

    acc_ref[...] += jnp.dot(x_ref[...], w_ref[...],
                            preferred_element_type=jnp.float32)

    @pl.when(k == pl.num_programs(2) - 1)
    def _():
        y = acc_ref[...] + b_ref[...].astype(jnp.float32)
        o_ref[...] = jnp.maximum(y, 0.0).astype(o_ref.dtype)


def _matmul_ln_relu_kernel(x_ref, w_ref, g_ref, beta_ref, o_ref, acc_ref, *,
                           cout, eps):
    k = pl.program_id(1)

    @pl.when(k == 0)
    def _():
        acc_ref[...] = jnp.zeros_like(acc_ref)

    acc_ref[...] += jnp.dot(x_ref[...], w_ref[...],
                            preferred_element_type=jnp.float32)

    @pl.when(k == pl.num_programs(1) - 1)
    def _():
        y = acc_ref[...]
        inv_n = jnp.float32(1.0 / cout)
        # Padded feature columns of y are exactly 0 (zero-padded W, no bias),
        # so sum over the padded row divided by the *real* cout is the exact
        # mean.
        mean = jnp.sum(y, axis=-1, keepdims=True) * inv_n
        # Centered variance (numerically safer than E[y^2] - mean^2).  Mask
        # the padded columns, which would otherwise each contribute mean^2.
        col = jax.lax.broadcasted_iota(jnp.int32, y.shape, dimension=1)
        yc = jnp.where(col < cout, y - mean, 0.0)
        var = jnp.sum(yc * yc, axis=-1, keepdims=True) * inv_n
        yhat = yc * jax.lax.rsqrt(var + eps)
        z = (yhat * g_ref[...].astype(jnp.float32)
             + beta_ref[...].astype(jnp.float32))
        o_ref[...] = jnp.maximum(z, 0.0).astype(o_ref.dtype)


# ---------------------------------------------------------------------------
# Wrapper
# ---------------------------------------------------------------------------
def basic1d_forward(x, w, b=None, ln_gamma=None, ln_beta=None, *, bias=True,
                    eps=1e-5, compute_dtype=None,
                    tm_max=512, tn_max=512, tk_max=512,
                    split_for_megacore=True):
    """Basic1d forward.

    x: (N, Cin); w: (Cin, Cout) (= PyTorch weight.T); b / ln_gamma / ln_beta:
    (1, Cout) or (Cout,).

    compute_dtype: optionally cast the matmul operands (e.g. jnp.bfloat16) for
    the fast MXU path and halved input HBM traffic; accumulation stays f32.
    For inference, callers can pre-pad / pre-cast W once outside this call.
    """
    n, cin = x.shape
    cin_w, cout = w.shape
    assert cin_w == cin, "weight must be laid out (Cin, Cout)"

    out_dtype = x.dtype
    in_dtype = jnp.dtype(compute_dtype) if compute_dtype is not None else x.dtype
    sub = _sublane_multiple(in_dtype)

    # (sublane, lane)-aligned problem dims.  Tiles are picked as divisors of
    # these, so no padding beyond hardware alignment is ever introduced.
    mp = _round_up(n, sub)
    kp = _round_up(cin, 128)
    np_ = _round_up(cout, 128)

    tm = _pick_tile(mp, sub, tm_max)
    tk = _pick_tile(kp, 128, tk_max)
    if bias:
        tn = _pick_tile(np_, 128, tn_max)
    else:
        # LayerNorm reduces over the whole feature axis -> keep it in one
        # output block and tile only M / K.
        # TODO(synk): for very large Cout switch to a tiled-Cout two-pass LN
        # (accumulate per-row sum / sum-of-squares, normalize in a 2nd pass).
        tn = np_

    def _ln_vmem(tm_, tk_):
        ib = jnp.dtype(in_dtype).itemsize
        ob = jnp.dtype(out_dtype).itemsize
        return (tm_ * np_ * 4                 # f32 accumulator
                + 2 * tm_ * np_ * ob          # output double buffer
                + 2 * tm_ * tk_ * ib          # x double buffer
                + 2 * tk_ * np_ * ib          # w double buffer
                + 4 * np_ * 4)                # gamma / beta

    if not bias:
        # Keep the LN path comfortably inside scoped VMEM; shrink tm then tk.
        budget = 40 * 2 ** 20
        while _ln_vmem(tm, tk) > budget and tm > sub:
            tm = _pick_tile(mp, sub, max(sub, tm // 2))
        while _ln_vmem(tm, tk) > budget and tk > 128:
            tk = _pick_tile(kp, 128, max(128, tk // 2))

    # v7x has 2 TensorCores: ensure at least one "parallel" grid axis has >= 2
    # blocks when the problem allows it (harmless on single-TC v5e / v6e).
    if split_for_megacore:
        if bias and (mp // tm) * (np_ // tn) == 1:
            if mp // sub >= 2:
                tm = _pick_tile(mp, sub, max(sub, mp // 2))
            elif np_ // 128 >= 2:
                tn = _pick_tile(np_, 128, max(128, np_ // 2))
        elif (not bias) and mp // tm == 1 and mp // sub >= 2:
            tm = _pick_tile(mp, sub, max(sub, mp // 2))

    def _pad2(a, rows, cols, dtype):
        a = a.reshape(a.shape[-2] if a.ndim == 2 else 1, -1) if a.ndim != 2 else a
        pr, pc = rows - a.shape[0], cols - a.shape[1]
        if pr or pc:
            a = jnp.pad(a, ((0, pr), (0, pc)))
        return a.astype(dtype)

    xp = _pad2(x, mp, kp, in_dtype)
    wp = _pad2(w, kp, np_, in_dtype)
    out_shape = jax.ShapeDtypeStruct((mp, np_), out_dtype)

    if bias:
        assert b is not None
        bp = _pad2(b.reshape(1, -1), 1, np_, jnp.float32)
        grid = (mp // tm, np_ // tn, kp // tk)
        out = pl.pallas_call(
            _matmul_bias_relu_kernel,
            out_shape=out_shape,
            grid_spec=pltpu.PrefetchScalarGridSpec(
                num_scalar_prefetch=0,
                grid=grid,
                in_specs=[
                    # TODO(synk): on v5e, sweep pipeline_mode=pl.Buffered(3) on
                    # the x / w specs to hide exposed DMA at low HBM bandwidth.
                    pl.BlockSpec((tm, tk), lambda i, j, k: (i, k)),
                    pl.BlockSpec((tk, tn), lambda i, j, k: (k, j)),
                    pl.BlockSpec((1, tn), lambda i, j, k: (0, j)),
                ],
                out_specs=pl.BlockSpec((tm, tn), lambda i, j, k: (i, j)),
                scratch_shapes=[pltpu.VMEM((tm, tn), jnp.float32)],
            ),
            compiler_params=pltpu.CompilerParams(
                dimension_semantics=("parallel", "parallel", "arbitrary")),
        )(xp, wp, bp)
    else:
        assert ln_gamma is not None and ln_beta is not None
        gp = _pad2(ln_gamma.reshape(1, -1), 1, np_, jnp.float32)
        betap = _pad2(ln_beta.reshape(1, -1), 1, np_, jnp.float32)
        grid = (mp // tm, kp // tk)
        kernel = functools.partial(_matmul_ln_relu_kernel, cout=cout, eps=eps)
        est = _ln_vmem(tm, tk)
        vmem_limit = (int(min(est * 5 // 4, 48 * 2 ** 20))
                      if est > 24 * 2 ** 20 else None)
        out = pl.pallas_call(
            kernel,
            out_shape=out_shape,
            grid_spec=pltpu.PrefetchScalarGridSpec(
                num_scalar_prefetch=0,
                grid=grid,
                in_specs=[
                    pl.BlockSpec((tm, tk), lambda i, k: (i, k)),
                    pl.BlockSpec((tk, tn), lambda i, k: (k, 0)),
                    pl.BlockSpec((1, tn), lambda i, k: (0, 0)),
                    pl.BlockSpec((1, tn), lambda i, k: (0, 0)),
                ],
                out_specs=pl.BlockSpec((tm, tn), lambda i, k: (i, 0)),
                scratch_shapes=[pltpu.VMEM((tm, tn), jnp.float32)],
            ),
            compiler_params=pltpu.CompilerParams(
                dimension_semantics=("parallel", "arbitrary"),
                vmem_limit_bytes=vmem_limit),
        )(xp, wp, gp, betap)

    if (mp, np_) != (n, cout):
        out = out[:n, :cout]
    return out


# ---------------------------------------------------------------------------
# Reference + test
# ---------------------------------------------------------------------------
def _reference(x, w, b, g, beta, *, bias, eps=1e-5):
    y = x @ w
    if bias:
        y = y + b
    else:
        mean = jnp.mean(y, axis=-1, keepdims=True)
        var = jnp.mean(jnp.square(y - mean), axis=-1, keepdims=True)
        y = (y - mean) * jax.lax.rsqrt(var + eps) * g + beta
    return jnp.maximum(y, 0.0)


def _run_case(key, n, cin, cout, atol, rtol, compute_dtype=None):
    k0, k1, k2 = jax.random.split(key, 3)
    x = jax.random.normal(k0, (n, cin), dtype=jnp.float32)
    w = jax.random.normal(k1, (cin, cout), dtype=jnp.float32) / jnp.sqrt(cin)
    b = jax.random.normal(k2, (1, cout), dtype=jnp.float32) * 0.1
    g = jnp.ones((1, cout), dtype=jnp.float32)
    beta = jnp.zeros((1, cout), dtype=jnp.float32)

    # bias=True path: Linear + ReLU
    out_bias = jax.block_until_ready(
        basic1d_forward(x, w, b, bias=True, compute_dtype=compute_dtype))
    ref_bias = _reference(x, w, b, g, beta, bias=True)
    assert out_bias.shape == (n, cout)
    assert bool(jnp.allclose(out_bias, ref_bias, atol=atol, rtol=rtol)), \
        f"bias path mismatch ({n},{cin},{cout},{compute_dtype})"

    # bias=False path: Linear (no bias) + LayerNorm + ReLU
    out_ln = jax.block_until_ready(
        basic1d_forward(x, w, ln_gamma=g, ln_beta=beta, bias=False,
                        compute_dtype=compute_dtype))
    ref_ln = _reference(x, w, b, g, beta, bias=False)
    assert out_ln.shape == (n, cout)
    assert bool(jnp.allclose(out_ln, ref_ln, atol=atol, rtol=rtol)), \
        f"LN path mismatch ({n},{cin},{cout},{compute_dtype})"


if __name__ == "__main__":
    key = jax.random.PRNGKey(0)
    k_small, k_big, k_bf16 = jax.random.split(key, 3)

    # Small shapes consistent with Basic1d usage (batch, in_channels).
    _run_case(k_small, n=8, cin=32, cout=32, atol=2e-3, rtol=2e-3)

    # Non-multiple shapes: exercises alignment padding (cin 600->640,
    # cout 320->384), K-axis accumulation (5 K steps) and the megacore M-split.
    _run_case(k_big, n=384, cin=600, cout=320, atol=2e-3, rtol=2e-3)

    # bf16 operand path (f32 accumulation), loose tolerance vs f32 reference.
    _run_case(k_bf16, n=384, cin=600, cout=320, atol=5e-2, rtol=5e-2,
              compute_dtype=jnp.bfloat16)

    print("KERNEL_OK")
</pallas_src>

<mosaic_0001>
module attributes {stable_mosaic.version = 11 : i64} {
  func.func @_matmul_bias_relu_kernel(%arg0: i32, %arg1: i32, %arg2: i32, %arg3: memref<8x128xf32, #tpu.memory_space<vmem>>, %arg4: memref<128x128xf32, #tpu.memory_space<vmem>>, %arg5: memref<1x128xf32, #tpu.memory_space<vmem>>, %arg6: memref<8x128xf32, #tpu.memory_space<vmem>>, %arg7: memref<8x128xf32, #tpu.memory_space<vmem>>) attributes {dimension_semantics = [#tpu.dimension_semantics<parallel>, #tpu.dimension_semantics<parallel>, #tpu.dimension_semantics<arbitrary>], iteration_bounds = array<i64: 1, 1, 1>, scalar_prefetch = 0 : i64, scratch_operands = 1 : i64, tpu.core_type = #tpu.core_type<tc>, window_params = [{transform_indices = @transform_0, window_bounds = array<i64: 8, 128>}, {transform_indices = @transform_1, window_bounds = array<i64: 128, 128>}, {transform_indices = @transform_2, window_bounds = array<i64: 1, 128>}, {transform_indices = @transform_3, window_bounds = array<i64: 8, 128>}]} {
    %c0_i32 = arith.constant 0 : i32
    %0 = arith.cmpi eq, %arg2, %c0_i32 : i32
    %1 = arith.extui %0 : i1 to i32
    %c0_i32_0 = arith.constant 0 : i32
    %2 = arith.cmpi ne, %1, %c0_i32_0 : i32
    scf.if %2 {
      %cst_10 = arith.constant 0.000000e+00 : f32
      %12 = vector.broadcast %cst_10 : f32 to vector<8x128xf32>
      %c0_11 = arith.constant 0 : index
      %c0_12 = arith.constant 0 : index
      %13 = vector.load %arg7[%c0_11, %c0_12] : memref<8x128xf32, #tpu.memory_space<vmem>>, vector<8x128xf32>
      tpu.vector_store %arg7[%c0_11, %c0_12], %12 {strides = array<i32>} : memref<8x128xf32, #tpu.memory_space<vmem>>, vector<8x128xf32>,
    } else {
    }
    %c0 = arith.constant 0 : index
    %c0_1 = arith.constant 0 : index
    %3 = vector.load %arg7[%c0, %c0_1] : memref<8x128xf32, #tpu.memory_space<vmem>>, vector<8x128xf32>
    %c0_2 = arith.constant 0 : index
    %c0_3 = arith.constant 0 : index
    %4 = vector.load %arg3[%c0_2, %c0_3] : memref<8x128xf32, #tpu.memory_space<vmem>>, vector<8x128xf32>
    %c0_4 = arith.constant 0 : index
    %c0_5 = arith.constant 0 : index
    %5 = vector.load %arg4[%c0_4, %c0_5] : memref<128x128xf32, #tpu.memory_space<vmem>>, vector<128x128xf32>
    %cst = arith.constant dense<0.000000e+00> : vector<8x128xf32>
    %6 = tpu.matmul %4, %5, %cst {dimension_numbers = #tpu.dot_dimension_numbers<[1], [0], [0], [1], [0, 0, 1, 1], [], []>} : vector<8x128xf32>, vector<128x128xf32>, vector<8x128xf32> -> vector<8x128xf32>
    %7 = arith.addf %3, %6 : vector<8x128xf32>
    %c0_6 = arith.constant 0 : index
    %c0_7 = arith.constant 0 : index
    %8 = vector.load %arg7[%c0_6, %c0_7] : memref<8x128xf32, #tpu.memory_space<vmem>>, vector<8x128xf32>
    tpu.vector_store %arg7[%c0_6, %c0_7], %7 {strides = array<i32>} : memref<8x128xf32, #tpu.memory_space<vmem>>, vector<8x128xf32>,
    %c0_i32_8 = arith.constant 0 : i32
    %9 = arith.cmpi eq, %arg2, %c0_i32_8 : i32
    %10 = arith.extui %9 : i1 to i32
    %c0_i32_9 = arith.constant 0 : i32
    %11 = arith.cmpi ne, %10, %c0_i32_9 : i32
    scf.if %11 {
      %c0_10 = arith.constant 0 : index
      %c0_11 = arith.constant 0 : index
      %12 = vector.load %arg7[%c0_10, %c0_11] : memref<8x128xf32, #tpu.memory_space<vmem>>, vector<8x128xf32>
      %c0_12 = arith.constant 0 : index
      %c0_13 = arith.constant 0 : index
      %13 = vector.load %arg5[%c0_12, %c0_13] : memref<1x128xf32, #tpu.memory_space<vmem>>, vector<1x128xf32>
      %14 = vector.broadcast %13 : vector<1x128xf32> to vector<8x128xf32>
      %15 = arith.addf %12, %14 : vector<8x128xf32>
      %cst_14 = arith.constant 0.000000e+00 : f32
      %16 = vector.broadcast %cst_14 : f32 to vector<8x128xf32>
      %17 = arith.maximumf %15, %16 : vector<8x128xf32>
      %c0_15 = arith.constant 0 : index
      %c0_16 = arith.constant 0 : index
      %18 = vector.load %arg6[%c0_15, %c0_16] : memref<8x128xf32, #tpu.memory_space<vmem>>, vector<8x128xf32>
      tpu.vector_store %arg6[%c0_15, %c0_16], %17 {strides = array<i32>} : memref<8x128xf32, #tpu.memory_space<vmem>>, vector<8x128xf32>,
    } else {
    }
    return
  }
  func.func @transform_0(%arg0: i32, %arg1: i32, %arg2: i32) -> (i32, i32) {
    %c0_i32 = arith.constant 0 : i32
    return %arg0, %arg2 : i32, i32
  }
  func.func @transform_1(%arg0: i32, %arg1: i32, %arg2: i32) -> (i32, i32) {
    %c0_i32 = arith.constant 0 : i32
    return %arg2, %arg1 : i32, i32
  }
  func.func @transform_2(%arg0: i32, %arg1: i32, %arg2: i32) -> (i32, i32) {
    %c0_i32 = arith.constant 0 : i32
    %c0_i32_0 = arith.constant 0 : i32
    return %c0_i32, %arg1 : i32, i32
  }
  func.func @transform_3(%arg0: i32, %arg1: i32, %arg2: i32) -> (i32, i32) {
    %c0_i32 = arith.constant 0 : i32
    return %arg0, %arg1 : i32, i32
  }
}

</mosaic_0001>

<bundles_post_ra>
// kernel: tpu_custom_call.1
= control target key start
LH: loop header
LB: loop body
LE: loop exit
PB: predicated region body
PF: predicated region fallthrough
CT: control target
= control target key end

     0   :  { %8 = vsyncpa [#allocation4], 0  ;;  %s397_s0 = inlined_call_operand.hbm [shape: f32[8,128], index: 0, kind: input, shape index: {}]   ;;  %s398_s1 = inlined_call_operand.hbm [shape: f32[128,128], index: 1, kind: input, shape index: {}]   ;;  %s399_s2 = inlined_call_operand.vmem [shape: f32[1,128], index: 2, kind: input, shape index: {}]   ;;  %s400_s3 = inlined_call_operand.hbm [shape: f32[8,128], index: 3, kind: output, shape index: {}]  }
   0x1   :  { %9 = vsyncpa [#allocation7], 0 }
   0x2   :  { %10 = vsyncpa [#allocation5], 0  ;;  %s323_s12 = smov [#allocation3]   ;;  %s324_s14 = smov [#allocation6]  }
   0x3   :  { %s17_s13 = sshll.u32 %s323_s12, 4  ;;  %s26_s15 = sshll.u32 %s324_s14, 4  ;;  %s18_s13 = int_to_ptr.vmem [resolvable:$true] %s17_s13  ;;  %s351_s15 = int_to_ptr.vmem [resolvable:$true] %s26_s15 }
   0x4   :  { %s251_s18 = scalar_lea.hbm %s397_s0, 128 }
   0x5   :  { %p252_p0 = scmp.ne.s32.totalorder %s397_s0, %s251_s18  ;;  %p255_p1 = scmp.lt.u32.totalorder %s251_s18, %s397_s0 }
   0x7   :  { %p257_p2 = pnand %p255_p1, %p252_p0 }
   0x9   :  { %260 = shalt.err (!%p257_p2)
}
   0xa   :  { %s261_s23 = scalar_lea.vmem %s18_s13, 128  ;;  %p266_p4 = scmp.lt.s32.totalorder %s18_s13, %s18_s13 }
   0xb   :  { %p262_p3 = scmp.ne.s32.totalorder %s18_s13, %s261_s23  ;;  %p267_p5 = scmp.lt.s32.totalorder %s261_s23, %s261_s23 }
   0xd   :  { %p268_p6 = por %p267_p5, %p266_p4 }
   0xf   :  { %p269_p7 = pnand %p268_p6, %p262_p3 }
  0x11   :  { %272 = shalt.err (!%p269_p7)
}
  0x12   :  { %20 = dma.hbm_to_vmem [thread:$0]  %s397_s0, 128, %s18_s13, [#allocation4]  }
  0x13   :  { %s273_s28 = scalar_lea.hbm %s398_s1, 2048 }
  0x14   :  { %p274_p8 = scmp.ne.s32.totalorder %s398_s1, %s273_s28  ;;  %p277_p9 = scmp.lt.u32.totalorder %s273_s28, %s398_s1 }
  0x16   :  { %p279_p10 = pnand %p277_p9, %p274_p8 }
  0x18   :  { %282 = shalt.err (!%p279_p10)
}
  0x19   :  { %s283_s6 = scalar_lea.vmem %s351_s15, 2048  ;;  %p288_p12 = scmp.lt.s32.totalorder %s351_s15, %s351_s15 }
  0x1a   :  { %p284_p11 = scmp.ne.s32.totalorder %s351_s15, %s283_s6  ;;  %p289_p13 = scmp.lt.s32.totalorder %s283_s6, %s283_s6 }
  0x1c   :  { %p290_p0 = por %p289_p13, %p288_p12 }
  0x1e   :  { %p291_p1 = pnand %p290_p0, %p284_p11 }
  0x20   :  { %294 = shalt.err (!%p291_p1)
}
  0x21   :  { %s325_s0 = smov 128   ;;  %s326_s7 = smov 8  }
  0x22   :  { %32 = dma.hbm_to_vmem [thread:$0]  %s398_s1, 2048, %s351_s15, [#allocation7], %s325_s0, %s325_s0, %s326_s7  }
  0x23   :  { %317 = dma.done.wait [#allocation4], 128  }
  0x24   :  { %318 = vsyncadd [#allocation4], 4294967168 }
  0x25   :  { %319 = dma.done.wait [#allocation7], 2048  }
  0x26   :  { %320 = vsyncadd [#allocation7], 4294965248  ;;  %v327_v0 = vmov 0.0|0.0   ;;  %vm328_vm0 = vmmov 0   ;;  %v329_v1 = vmov 0.0   ;;  %v48_v2 = vld [vmem:[#allocation6] sm:$0xff] }
  0x27   :  { %219 = vmatprep.subr.bf16.mxu0 %v327_v0  ;;  %216 = vmatprep.mubr.msk.f32.mxu0 %vm328_vm0, %v329_v1  ;;  %v49_v3 = vld [vmem:[#allocation6 + $0x8] sm:$0xff]  ;;  %v50_v4 = vld [vmem:[#allocation6 + $0x10] sm:$0xff]  ;;  %v51_v6 = vld [vmem:[#allocation6 + $0x18] sm:$0xff]  ;;  %s330_s11 = smov [#allocation8]  }
  0x28   :  { %v220_v5 = vpack.c.bf16 %v49_v3, %v48_v2  ;;  %v223_v7 = vpack.c.bf16 %v51_v6, %v50_v4  ;;  %v52_v8 = vld [vmem:[#allocation6 + $0x20] sm:$0xff]  ;;  %v53_v9 = vld [vmem:[#allocation6 + $0x28] sm:$0xff]  ;;  %v54_v11 = vld [vmem:[#allocation6 + $0x30] sm:$0xff]  ;;  %s156_s12 = sshll.u32 %s330_s11, 4  ;;  %s157_s12 = int_to_ptr.vmem [resolvable:$true] %s156_s12 }
  0x29   :  { %v226_v10 = vpack.c.bf16 %v53_v9, %v52_v8  ;;  %v55_v12 = vld [vmem:[#allocation6 + $0x38] sm:$0xff]  ;;  %v56_v14 = vld [vmem:[#allocation6 + $0x40] sm:$0xff]  ;;  %v57_v15 = vld [vmem:[#allocation6 + $0x48] sm:$0xff]  ;;  %s295_s13 = scalar_lea.vmem %s157_s12, 128  ;;  %p300_p3 = scmp.lt.s32.totalorder %s157_s12, %s157_s12 }
  0x2a   :  { %221 = vmatpush3.bf16.msra.mxu0 %v220_v5  ;;  %v229_v13 = vpack.c.bf16 %v55_v12, %v54_v11  ;;  %v232_v16 = vpack.c.bf16 %v57_v15, %v56_v14  ;;  %v58_v17 = vld [vmem:[#allocation6 + $0x50] sm:$0xff]  ;;  %v59_v18 = vld [vmem:[#allocation6 + $0x58] sm:$0xff]  ;;  %v60_v20 = vld [vmem:[#allocation6 + $0x60] sm:$0xff]  ;;  %p296_p2 = scmp.ne.s32.totalorder %s157_s12, %s295_s13  ;;  %p301_p4 = scmp.lt.s32.totalorder %s295_s13, %s295_s13 }
  0x2b   :  { %222 = vmatprep.subr.bf16.mxu0 %v327_v0  ;;  %v235_v19 = vpack.c.bf16 %v59_v18, %v58_v17  ;;  %v61_v21 = vld [vmem:[#allocation6 + $0x68] sm:$0xff]  ;;  %v62_v23 = vld [vmem:[#allocation6 + $0x70] sm:$0xff]  ;;  %v63_v24 = vld [vmem:[#allocation6 + $0x78] sm:$0xff] }
  0x2c   :  { %v238_v22 = vpack.c.bf16 %v61_v21, %v60_v20  ;;  %v241_v25 = vpack.c.bf16 %v63_v24, %v62_v23  ;;  %v47_v26 = vld [vmem:[#allocation3] sm:$0xff]  ;;  %p302_p5 = por %p301_p4, %p300_p3 }
  0x2d   :  { %v166_v27 = vld [vmem:[%s399_s2] ss:$0 sm:$0xff] }
  0x2e   :  { %224 = vmatpush3.bf16.msra.mxu0 %v223_v7  ;;  %p303_p6 = pnand %p302_p5, %p296_p2 }
  0x2f   :  { %225 = vmatprep.subr.bf16.mxu0 %v327_v0 }
  0x32   :  { %227 = vmatpush3.bf16.msra.mxu0 %v226_v10 }
  0x33   :  { %228 = vmatprep.subr.bf16.mxu0 %v327_v0 }
  0x36   :  { %230 = vmatpush3.bf16.msra.mxu0 %v229_v13 }
  0x37   :  { %231 = vmatprep.subr.bf16.mxu0 %v327_v0 }
  0x3a   :  { %233 = vmatpush3.bf16.msra.mxu0 %v232_v16 }
  0x3b   :  { %234 = vmatprep.subr.bf16.mxu0 %v327_v0 }
  0x3e   :  { %236 = vmatpush3.bf16.msra.mxu0 %v235_v19 }
  0x3f   :  { %237 = vmatprep.subr.bf16.mxu0 %v327_v0 }
  0x42   :  { %239 = vmatpush3.bf16.msra.mxu0 %v238_v22 }
  0x43   :  { %240 = vmatprep.subr.bf16.mxu0 %v327_v0 }
  0x46   :  { %242 = vmatpush3.bf16.msra.mxu0 %v241_v25 }
  0x49   :  { %217 = vmatmul.mubr.f32.vlgmr.msra.gmra.mrb[0].mxu0 %v47_v26 }
 0x11c   :  { %v130_v28 = vpop.f32.mrb[0].mxu0 }
 0x11d   :  { %v147_v29 = vadd.f32 %v166_v27, %v130_v28  ;;  %v218_v30 = vpop.f32.mrb[1].mxu0 }
 0x11f   :  { %v148_v31 = vmax.f32 %v147_v29, 0.0 }
 0x121   :  { %149 = vst [vmem:[#allocation8] sm:$0xff] %v148_v31 }
 0x122   :  { %306 = shalt.err (!%p303_p6)
}
 0x123   :  { %s307_s16 = scalar_lea.hbm %s400_s3, 128 }
 0x124   :  { %p308_p7 = scmp.ne.s32.totalorder %s400_s3, %s307_s16  ;;  %p311_p8 = scmp.lt.u32.totalorder %s307_s16, %s400_s3 }
 0x126   :  { %p313_p9 = pnand %p311_p8, %p308_p7 }
 0x128   :  { %316 = shalt.err (!%p313_p9)
}
 0x129   :  { %159 = dma.vmem_to_hbm [thread:$0]  %s157_s12, 128, %s400_s3, [#allocation5]  }
 0x12a   :  { %321 = dma.done.wait [#allocation5], 128  }
 0x12b   :  { %322 = vsyncadd [#allocation5], 4294967168 }
 0x12c   :  { %163 = vsyncpa [#allocation4], 1 }
 0x12d   :  { %164 = vsyncpa [#allocation7], 1 }
 0x12e   :  { %165 = vsyncpa [#allocation5], 1 }

</bundles_post_ra>
